<compile_context>
chip_gen: v7x
topology: tpu7x:2x2x1
jax: 0.10.0
libtpu: 0.0.40
codegen_flags: <defaults>
</compile_context>

<pallas_src>
import math

import jax
import jax.numpy as jnp
from jax.experimental import pallas as pl
from jax.experimental.pallas import tpu as pltpu


def _make_sinusoid_kernel(tile_rows: int, pp: int):
    """Kernel filling one (tile_rows, width) block of the row-major table.

    A, B are precomputed per-lane constants (shape (1, width) when pp == 1,
    else pre-tiled to (tile_rows, width)); their index_map is constant so they
    stay VMEM-resident across the whole grid.
    """
    q_per_block = tile_rows // pp

    def kernel(a_ref, b_ref, out_ref):
        base_q = pl.program_id(0) * q_per_block
        row = jax.lax.broadcasted_iota(jnp.int32, (tile_rows, 1), 0)
        q = row if pp == 1 else row // pp
        q_f32 = (base_q + q).astype(jnp.float32)            # (tile_rows, 1)
        # One FMA + one sin per element (cos folded into B as a pi/2 phase).
        arg = q_f32 * a_ref[...] + b_ref[...]
        out_ref[...] = jnp.sin(arg).astype(out_ref.dtype)

    return kernel


def _lane_tables(d_model: int, width: int, pp: int, positions_per_period: int):
    """Per-lane constants A, B (f32, shape (pp, width)) for the flattened layout.

    For flat element f = r*width + l:  position = (r // pp) * P + (f' // d_model)
    and column = f' % d_model with f' = (r % pp)*width + l, so
        arg = q * A + B,  A = P * inv_freq(col),
                          B = (f' // d_model) * inv_freq(col) + phase(col).
    """
    rr = jnp.arange(pp, dtype=jnp.int32)[:, None]            # (pp, 1)
    lane = jnp.arange(width, dtype=jnp.int32)[None, :]       # (1, width)
    flat = rr * width + lane                                 # flat idx within a period
    col = flat % d_model                                     # column in [0, d_model)
    pos_in_period = (flat // d_model).astype(jnp.float32)
    parity = col & 1                                         # 0 -> sin col, 1 -> cos col
    two_i = (col - parity).astype(jnp.float32)               # "2i" of the PyTorch formula
    inv_freq = jnp.exp(two_i * (-math.log(10000.0) / float(d_model)))
    phase = parity.astype(jnp.float32) * (math.pi / 2.0)     # cos(x) == sin(x + pi/2)
    a = float(positions_per_period) * inv_freq
    b = pos_in_period * inv_freq + phase
    return a, b


def make_positional_encoding_table(max_len: int, d_model: int,
                                   dtype=jnp.float32,
                                   target_tile_bytes: int = 2 * 1024 * 1024) -> jax.Array:
    """Builds the (max_len, d_model) sinusoid table with a tiled Pallas kernel."""
    # ---- output layout: lane-dense (full 128-wide stores) whenever possible.
    if d_model % 128 == 0:
        width, pp = d_model, 1
    elif (max_len * d_model) % 128 == 0:
        width = 128
        pp = d_model // math.gcd(d_model, 128)               # lcm(d_model,128) // 128
    else:
        # TODO(synk): this shape cannot be regrouped into full 128-lane rows;
        # falls back to width=d_model with masked (vst.msk) partial stores.
        width, pp = d_model, 1
    positions_per_period = pp * width // d_model
    total_rows = (max_len * d_model) // width

    # ---- tile rows: ~target_tile_bytes per output buffer, aligned to the
    #      8-sublane requirement and to the lane-table period pp.
    itemsize = jnp.dtype(dtype).itemsize
    # When pp > 1 the A/B lane tables are pre-tiled to (tile_rows, width) f32
    # and sit in VMEM alongside the output tile -> budget them in.
    row_bytes = width * (itemsize + (8 if pp > 1 else 0))
    align = (8 * pp) // math.gcd(8, pp)
    tile_rows = max(align, (target_tile_bytes // row_bytes) // align * align)
    if tile_rows >= total_rows:
        # Prefer >= 2 blocks so dimension_semantics=("parallel",) can shard the
        # grid across both TensorCores on v7x (neutral on 1-TC v5e/v6e).
        half = (total_rows // 2) // align * align
        tile_rows = half if half >= align else total_rows
    n_blocks = pl.cdiv(total_rows, tile_rows)

    # ---- per-lane constants, computed once in the wrapper (not per grid step).
    a, b = _lane_tables(d_model, width, pp, positions_per_period)
    if pp > 1:
        reps = tile_rows // pp
        a = jnp.tile(a, (reps, 1))
        b = jnp.tile(b, (reps, 1))

    table = pl.pallas_call(
        _make_sinusoid_kernel(tile_rows, pp),
        out_shape=jax.ShapeDtypeStruct((total_rows, width), dtype),
        grid=(n_blocks,),
        in_specs=[pl.BlockSpec(a.shape, lambda i: (0, 0)),
                  pl.BlockSpec(b.shape, lambda i: (0, 0))],
        out_specs=pl.BlockSpec((tile_rows, width), lambda i: (i, 0)),
        compiler_params=pltpu.CompilerParams(
            dimension_semantics=("parallel",)),
    )(a, b)
    return table.reshape(max_len, d_model)


def positional_encoding_forward(x: jax.Array, encoding: jax.Array) -> jax.Array:
    """Equivalent of PositionalEncoding.forward: returns encoding[:seq_len, :]."""
    _, seq_len = x.shape
    return encoding[:seq_len, :]


def _reference_table(max_len: int, d_model: int) -> jnp.ndarray:
    # Pure-JAX reference mirroring the PyTorch __init__ exactly.
    enc = jnp.zeros((max_len, d_model), dtype=jnp.float32)
    pos = jnp.arange(max_len, dtype=jnp.float32)[:, None]
    _2i = jnp.arange(0, d_model, 2, dtype=jnp.float32)
    arg = pos / (10000.0 ** (_2i / d_model))
    enc = enc.at[:, 0::2].set(jnp.sin(arg))
    enc = enc.at[:, 1::2].set(jnp.cos(arg))
    return enc


if __name__ == "__main__":
    # Module hyperparameters (small, deterministic).
    d_model = 32
    max_len = 16
    batch, seq_len = 2, 8

    key = jax.random.PRNGKey(0)
    x = jax.random.randint(key, (batch, seq_len), minval=0, maxval=100, dtype=jnp.int32)

    # Build the encoding table with the Pallas kernel (lane-dense path, pp=1).
    encoding = jax.block_until_ready(make_positional_encoding_table(max_len, d_model))

    # Forward pass.
    out = jax.block_until_ready(positional_encoding_forward(x, encoding))

    ref = _reference_table(max_len, d_model)[:seq_len, :]
    assert out.shape == (seq_len, d_model), out.shape
    assert out.dtype == jnp.float32, out.dtype
    assert jnp.allclose(out, ref, atol=2e-5, rtol=1e-5), "mismatch vs reference"

    # Extra sanity checks on the other code paths:
    # (a) d_model multiple of 128, two blocks (v7x dual-TC sharding).
    enc2 = jax.block_until_ready(make_positional_encoding_table(64, 128))
    assert jnp.allclose(enc2, _reference_table(64, 128), atol=2e-5, rtol=1e-5)
    # (b) many tiny 8-row blocks (exercises program_id offsets in the FMA).
    enc3 = jax.block_until_ready(
        make_positional_encoding_table(64, 128, target_tile_bytes=8 * 128 * 4))
    assert jnp.allclose(enc3, _reference_table(64, 128), atol=2e-5, rtol=1e-5)
    # (c) generalized lane-dense path: d_model=96 neither divides nor is a
    #     multiple of 128 (periodic lane tables, pp=3, pre-tiled A/B).
    enc4 = jax.block_until_ready(make_positional_encoding_table(64, 96))
    assert jnp.allclose(enc4, _reference_table(64, 96), atol=1e-4, rtol=1e-4)
    # (d) realistic max_len: f32 argument precision at pos ~ 4k limits the
    #     cos-via-sin(x+pi/2) columns to ~1e-3 agreement (expected, not a bug).
    enc5 = jax.block_until_ready(make_positional_encoding_table(4096, 128))
    assert jnp.allclose(enc5, _reference_table(4096, 128), atol=5e-3, rtol=5e-3)

    print("KERNEL_OK")
</pallas_src>

<mosaic_0001>
module attributes {stable_mosaic.version = 11 : i64} {
  func.func @kernel(%arg0: i32, %arg1: memref<1x128xf32, #tpu.memory_space<vmem>>, %arg2: memref<1x128xf32, #tpu.memory_space<vmem>>, %arg3: memref<4x128xf32, #tpu.memory_space<vmem>>) attributes {dimension_semantics = [#tpu.dimension_semantics<parallel>], iteration_bounds = array<i64: 1>, scalar_prefetch = 0 : i64, scratch_operands = 0 : i64, tpu.core_type = #tpu.core_type<tc>, window_params = [{pipeline_mode = #tpu.pipeline_mode<synchronous>, transform_indices = @transform_0, window_bounds = array<i64: 1, 128>}, {pipeline_mode = #tpu.pipeline_mode<synchronous>, transform_indices = @transform_1, window_bounds = array<i64: 1, 128>}, {transform_indices = @transform_2, window_bounds = array<i64: 4, 128>}]} {
    %c4_i32 = arith.constant 4 : i32
    %0 = arith.muli %arg0, %c4_i32 : i32
    %1 = tpu.iota {dimensions = array<i32: 0>} : vector<4x1xi32>
    %2 = vector.broadcast %0 : i32 to vector<4x1xi32>
    %3 = arith.addi %2, %1 : vector<4x1xi32>
    %4 = arith.sitofp %3 : vector<4x1xi32> to vector<4x1xf32>
    %c0 = arith.constant 0 : index
    %c0_0 = arith.constant 0 : index
    %5 = vector.load %arg1[%c0, %c0_0] : memref<1x128xf32, #tpu.memory_space<vmem>>, vector<1x128xf32>
    %6 = vector.broadcast %4 : vector<4x1xf32> to vector<4x128xf32>
    %7 = vector.broadcast %5 : vector<1x128xf32> to vector<4x128xf32>
    %8 = arith.mulf %6, %7 : vector<4x128xf32>
    %c0_1 = arith.constant 0 : index
    %c0_2 = arith.constant 0 : index
    %9 = vector.load %arg2[%c0_1, %c0_2] : memref<1x128xf32, #tpu.memory_space<vmem>>, vector<1x128xf32>
    %10 = vector.broadcast %9 : vector<1x128xf32> to vector<4x128xf32>
    %11 = arith.addf %8, %10 : vector<4x128xf32>
    %12 = math.sin %11 : vector<4x128xf32>
    %c0_3 = arith.constant 0 : index
    %c0_4 = arith.constant 0 : index
    %13 = vector.load %arg3[%c0_3, %c0_4] : memref<4x128xf32, #tpu.memory_space<vmem>>, vector<4x128xf32>
    tpu.vector_store %arg3[%c0_3, %c0_4], %12 {strides = array<i32>} : memref<4x128xf32, #tpu.memory_space<vmem>>, vector<4x128xf32>,
    return
  }
  func.func @transform_0(%arg0: i32) -> (i32, i32) {
    %c0_i32 = arith.constant 0 : i32
    %c0_i32_0 = arith.constant 0 : i32
    %c0_i32_1 = arith.constant 0 : i32
    return %c0_i32, %c0_i32_0 : i32, i32
  }
  func.func @transform_1(%arg0: i32) -> (i32, i32) {
    %c0_i32 = arith.constant 0 : i32
    %c0_i32_0 = arith.constant 0 : i32
    %c0_i32_1 = arith.constant 0 : i32
    return %c0_i32, %c0_i32_0 : i32, i32
  }
  func.func @transform_2(%arg0: i32) -> (i32, i32) {
    %c0_i32 = arith.constant 0 : i32
    %c0_i32_0 = arith.constant 0 : i32
    return %arg0, %c0_i32 : i32, i32
  }
}

</mosaic_0001>

<bundles_post_ra>
// kernel: tpu_custom_call.1
= control target key start
LH: loop header
LB: loop body
LE: loop exit
PB: predicated region body
PF: predicated region fallthrough
CT: control target
= control target key end

     0   :  { %7 = vsyncpa [#allocation3], 0  ;;  %s307_s0 = inlined_call_operand.hbm [shape: f32[1,128], index: 0, kind: input, shape index: {}]   ;;  %s308_s1 = inlined_call_operand.vmem [shape: f32[1,128], index: 1, kind: input, shape index: {}]   ;;  %s309_s2 = inlined_call_operand.hbm [shape: f32[4,128], index: 2, kind: output, shape index: {}]  }
   0x1   :  { %8 = vsyncpa [#allocation4], 0  ;;  %s236_s9 = smov [#allocation2]   ;;  %s188_s13 = scalar_lea.hbm %s307_s0, 16 }
   0x2   :  { %s15_s10 = sshll.u32 %s236_s9, 4  ;;  %p189_p0 = scmp.ne.s32.totalorder %s307_s0, %s188_s13  ;;  %s16_s10 = int_to_ptr.vmem [resolvable:$true] %s15_s10 }
   0x3   :  { %p192_p1 = scmp.lt.u32.totalorder %s188_s13, %s307_s0 }
   0x5   :  { %p194_p2 = pnand %p192_p1, %p189_p0 }
   0x7   :  { %197 = shalt.err (!%p194_p2)
}
   0x8   :  { %s198_s18 = scalar_lea.vmem %s16_s10, 16  ;;  %s202_s19 = scalar_lea.vmem %s16_s10, 32 }
   0x9   :  { %p199_p3 = scmp.ne.s32.totalorder %s16_s10, %s198_s18  ;;  %p203_p4 = scmp.lt.s32.totalorder %s16_s10, %s16_s10 }
   0xa   :  { %p204_p5 = scmp.lt.s32.totalorder %s202_s19, %s198_s18 }
   0xc   :  { %p205_p6 = por %p204_p5, %p203_p4 }
   0xe   :  { %p206_p7 = pnand %p205_p6, %p199_p3 }
  0x10   :  { %209 = shalt.err (!%p206_p7)
}
  0x11   :  { %18 = dma.hbm_to_vmem [thread:$0]  %s307_s0, 16, %s16_s10, [#allocation3]  }
  0x12   :  { %232 = dma.done.wait [#allocation3], 16  }
  0x13   :  { %233 = vsyncadd [#allocation3], 4294967280  ;;  %v25_v0 = vlaneseq  ;;  %v166_v3 = vld [vmem:[#allocation2] ss:$0 sm:$0xff]  ;;  %v237_v18 = vmov 683565275  }
  0x14   :  { %v167_v4 = vld [vmem:[%s308_s1] ss:$0 sm:$0xff]  ;;  %v238_v20 = vmov 2475754826   ;;  %v239_v22 = vmov 2131351028  }
  0x15   :  { %v26_v1 = vshrl.u32 %v25_v0, 7  ;;  %v240_v24 = vmov 2102212464   ;;  %v241_v26 = vmov 920167782   ;;  %s243_s0 = smov [#allocation5]  }
  0x16   :  { %v242_v33 = vmov 1326507024   ;;  %s157_s1 = sshll.u32 %s243_s0, 4  ;;  %s158_s1 = int_to_ptr.vmem [resolvable:$true] %s157_s1 }
  0x17   :  { %v29_v2 = vcvt.s32.f32 %v26_v1  ;;  %s210_s24 = scalar_lea.vmem %s158_s1, 64  ;;  %p215_p9 = scmp.lt.s32.totalorder %s158_s1, %s158_s1 }
  0x18   :  { %p211_p8 = scmp.ne.s32.totalorder %s158_s1, %s210_s24  ;;  %p216_p10 = scmp.lt.s32.totalorder %s210_s24, %s210_s24 }
  0x19   :  { %v37_v5 = vmul.f32 %v166_v3, %v29_v2 }
  0x1a   :  { %p217_p11 = por %p216_p10, %p215_p9 }
  0x1b   :  { %v274_v6 = vadd.f32 %v167_v4, %v37_v5 }
  0x1c   :  { %p218_p12 = pnand %p217_p11, %p211_p8 }
  0x1d   :  { %v49_v7 = vand.u32 2139095040, %v274_v6  ;;  %v46_v9 = vand.u32 2147483647, %v274_v6  ;;  %vm48_vm7 = vcmp.lt.s32.totalorder %v274_v6, 0  ;;  %vm138_vm12 = vweird.f32 %v274_v6 }
  0x1f   :  { %v50_v8 = vshrl.u32 %v49_v7, 23  ;;  %v53_v12 = vand.u32 8388607, %v46_v9  ;;  %vm47_vm8 = vcmp.le.f32.partialorder %v46_v9, 0.7853982 }
  0x21   :  { %v168_v10 = vadd.s32 4294967169, %v50_v8  ;;  %v54_v15 = vor.u32 8388608, %v53_v12 }
  0x23   :  { %v56_v11 = vadd.s32 1, %v168_v10  ;;  %v94_v35 = vshll.u32 %v54_v15, 8 }
  0x25   :  { %vm57_vm0 = vcmp.gt.s32.totalorder %v56_v11, 0 }
  0x26   :  { %v58_v13 = vsel %vm57_vm0, %v56_v11, 0 }
  0x27   :  { %v60_v14 = vand.u32 31, %v58_v13  ;;  %v59_v16 = vshrl.u32 %v58_v13, 5 }
  0x29   :  { %v61_v17 = vsub.s32 32, %v60_v14  ;;  %v63_v19 = vshll.u32 %v237_v18, %v60_v14  ;;  %v66_v21 = vshll.u32 %v238_v20, %v60_v14  ;;  %v69_v23 = vshll.u32 %v239_v22, %v60_v14 }
  0x2a   :  { %v72_v25 = vshll.u32 %v240_v24, %v60_v14  ;;  %v75_v27 = vshll.u32 %v241_v26, %v60_v14  ;;  %vm78_vm1 = vcmp.lt.s32.totalorder %v59_v16, 1  ;;  %vm81_vm2 = vcmp.lt.s32.totalorder %v59_v16, 4 }
  0x2b   :  { %v62_v28 = vshrl.u32 %v237_v18, %v61_v17  ;;  %v64_v29 = vshrl.u32 %v238_v20, %v61_v17  ;;  %v67_v30 = vshrl.u32 %v239_v22, %v61_v17  ;;  %v70_v31 = vshrl.u32 %v240_v24, %v61_v17 }
  0x2c   :  { %v73_v32 = vshrl.u32 %v241_v26, %v61_v17  ;;  %v76_v34 = vshrl.u32 %v242_v33, %v61_v17  ;;  %vm79_vm3 = vcmp.lt.s32.totalorder %v59_v16, 2  ;;  %vm80_vm4 = vcmp.lt.s32.totalorder %v59_v16, 3 }
  0x2d   :  { %v65_v36 = vor.u32 %v64_v29, %v63_v19  ;;  %v68_v37 = vor.u32 %v67_v30, %v66_v21  ;;  %v71_v38 = vor.u32 %v70_v31, %v69_v23 }
  0x2e   :  { %v74_v39 = vor.u32 %v73_v32, %v72_v25  ;;  %v77_v40 = vor.u32 %v76_v34, %v75_v27 }
  0x2f   :  { %v82_v41 = vsel %vm78_vm1, %v62_v28, %v65_v36  ;;  %v83_v42 = vsel %vm81_vm2, %v71_v38, 2102212464  ;;  %v86_v43 = vsel %vm78_vm1, %v65_v36, %v68_v37  ;;  %v90_v44 = vsel %vm78_vm1, %v68_v37, %v71_v38 }
  0x30   :  { %v84_v45 = vsel %vm80_vm4, %v68_v37, %v83_v42  ;;  %v87_v46 = vsel %vm81_vm2, %v74_v39, 920167782  ;;  %v91_v47 = vsel %vm81_vm2, %v77_v40, 1326507024 }
  0x31   :  { %v88_v48 = vsel %vm80_vm4, %v71_v38, %v87_v46  ;;  %v92_v49 = vsel %vm80_vm4, %v74_v39, %v91_v47  ;;  %v85_v50 = vsel %vm79_vm3, %v82_v41, %v84_v45 }
  0x32   :  { %v89_v51 = vsel %vm79_vm3, %v86_v43, %v88_v48  ;;  %v93_v52 = vsel %vm79_vm3, %v90_v44, %v92_v49  ;;  %v101_v57 = vmul.u32 %v94_v35, %v85_v50 }
  0x33   :  { %v280_v53 = vmul.u32.u64.low %v94_v35, %v93_v52  ;;  %v281_v54 = vmul.u32.u64.high %v94_v35, %v93_v52, %v280_v53  ;;  %v283_v55 = vmul.u32.u64.low %v94_v35, %v89_v51  ;;  %v284_v56 = vmul.u32.u64.high %v94_v35, %v89_v51, %v283_v55 }
  0x35   :  { %vm103_vm5 = vc.u32 %v281_v54, %v283_v55  ;;  %v104_v58 = vadd.s32 1, %v284_v56  ;;  %v102_v5 = vadd.s32 %v283_v55, %v281_v54 }
  0x37   :  { %v105_v59 = vsel %vm103_vm5, %v104_v58, %v284_v56 }
  0x38   :  { %v106_v60 = vadd.s32 %v105_v59, %v101_v57 }
  0x3a   :  { %v107_v61 = vadd.s32 536870912, %v106_v60 }
  0x3c   :  { %v108_v62 = vshrl.u32 %v107_v61, 30 }
  0x3e   :  { %v109_v63 = vshll.u32 %v108_v62, 30  ;;  %v132_v19 = vsub.s32 4, %v108_v62 }
  0x40   :  { %v110_v0 = vsub.s32 %v106_v60, %v109_v63  ;;  %v133_v22 = vsel %vm48_vm7, %v132_v19, %v108_v62 }
  0x41   :  { %v135_v25 = vsel %vm47_vm8, 0, %v133_v22 }
  0x42   :  { %v112_v1 = vsub.s32 0, %v110_v0  ;;  %v139_v26 = vadd.s32 3, %v135_v25 }
  0x44   :  { %v169_v2 = vmin.u32 %v112_v1, %v110_v0  ;;  %v140_v27 = vand.u32 3, %v139_v26 }
  0x46   :  { %v114_v3 = vclz %v169_v2  ;;  %vm145_vm9 = vcmp.eq.s32.totalorder %v140_v27, 2  ;;  %vm142_vm10 = vcmp.eq.s32.totalorder %v140_v27, 0  ;;  %vm141_vm11 = vcmp.lt.s32.totalorder %v140_v27, 2 }
  0x48   :  { %v170_v4 = vadd.s32 4294967294, %v114_v3 }
  0x4a   :  { %vm171_vm6 = vcmp.lt.s32.totalorder %v170_v4, 0 }
  0x4b   :  { %v117_v7 = vsel %vm171_vm6, 0, %v170_v4 }
  0x4c   :  { %v118_v8 = vsub.s32 32, %v117_v7  ;;  %v119_v10 = vshll.u32 %v110_v0, %v117_v7  ;;  %v122_v11 = vsub.s32 4294967266, %v117_v7 }
  0x4e   :  { %v120_v12 = vshrl.u32 %v102_v5, %v118_v8  ;;  %v123_v13 = vadd.s32 127, %v122_v11 }
  0x50   :  { %v121_v14 = vor.u32 %v120_v12, %v119_v10  ;;  %v124_v15 = vshll.u32 %v123_v13, 23 }
  0x52   :  { %v125_v16 = vor.u32 4788187, %v124_v15  ;;  %v128_v17 = vcvt.s32.f32 %v121_v14 }
  0x54   :  { %v126_v18 = vand.u32 2147483647, %v125_v16 }
  0x56   :  { %v129_v20 = vmul.f32 %v128_v17, %v126_v18 }
  0x58   :  { %v130_v21 = vxor.u32 2147483648, %v129_v20 }
  0x5a   :  { %v131_v23 = vsel %vm48_vm7, %v130_v21, %v129_v20 }
  0x5b   :  { %v134_v24 = vsel %vm47_vm8, %v274_v6, %v131_v23 }
  0x5c   :  { %184 = vcosq.f32 %v134_v24 }
  0x5d   :  { %186 = vsinq.f32 %v134_v24 }
  0x66   :  { %v185_v28 = vpop.eup %184 }
  0x67   :  { %v187_v29 = vpop.eup %186  ;;  %v146_v30 = vxor.u32 2147483648, %v185_v28 }
  0x68   :  { %v143_v31 = vxor.u32 2147483648, %v187_v29 }
  0x69   :  { %v147_v9 = vsel %vm145_vm9, %v146_v30, %v187_v29 }
  0x6a   :  { %v144_v32 = vsel %vm142_vm10, %v185_v28, %v143_v31 }
  0x6b   :  { %v148_v33 = vsel %vm141_vm11, %v144_v32, %v147_v9 }
  0x6c   :  { %v149_v34 = vsel %vm138_vm12, nan, %v148_v33 }
  0x6d   :  { %150 = vst [vmem:[#allocation5] sm:$0xf] %v149_v34 }
  0x6e   :  { %221 = shalt.err (!%p218_p12)
}
  0x6f   :  { %s222_s27 = scalar_lea.hbm %s309_s2, 64 }
  0x70   :  { %p223_p13 = scmp.ne.s32.totalorder %s309_s2, %s222_s27  ;;  %p226_p0 = scmp.lt.u32.totalorder %s222_s27, %s309_s2 }
  0x72   :  { %p228_p1 = pnand %p226_p0, %p223_p13 }
  0x74   :  { %231 = shalt.err (!%p228_p1)
}
  0x75   :  { %160 = dma.vmem_to_hbm [thread:$0]  %s158_s1, 64, %s309_s2, [#allocation4]  }
  0x76   :  { %234 = dma.done.wait [#allocation4], 64  }
  0x77   :  { %235 = vsyncadd [#allocation4], 4294967232 }
  0x78   :  { %164 = vsyncpa [#allocation3], 1 }
  0x79   :  { %165 = vsyncpa [#allocation4], 1 }

</bundles_post_ra>
